<compile_context>
chip_gen: v7x
topology: tpu7x:2x2x1
jax: 0.10.0
libtpu: 0.0.40
codegen_flags: <defaults>
</compile_context>

<pallas_src>
import jax
import jax.numpy as jnp
from jax.experimental import pallas as pl
from jax.experimental.pallas import tpu as pltpu

IN_FEATURES = 28 * 28   # 784
HIDDEN = 128
OUT_FEATURES = 2
TB_MAX = 1024           # max batch-tile rows (VMEM-safe in f32 and bf16)


def _cdiv(a, b):
    return (a + b - 1) // b


def _round_up(x, m):
    return ((x + m - 1) // m) * m


def _choose_tile(B):
    """Pick a batch tile that bounds dead rows in the partial edge block and
    gives the v7x megacore at least two grid steps once there is enough work."""
    if B <= 8:
        return B                        # block == full array dim (always legal)
    steps = max(_cdiv(B, TB_MAX), 2)    # >= 2 steps so both v7x TCs get work
    return _round_up(_cdiv(B, steps), 8)


def _normalize_tile(B, tb):
    """Ensure the (8,128) sublane rule: tb is a multiple of 8, or tb == B."""
    if tb >= B:
        return B
    if tb % 8 != 0:
        tb = _round_up(tb, 8)
    return min(tb, B) if tb < B else B


def _fused_kernel(x1_ref, x2_ref, wf1_ref, wf2_ref, bf_ref, o_ref):
    # out = x1 @ Wf1 + x2 @ Wf2 + bf   (exact affine fold of the 3 Linears).
    # x tiles may arrive as bf16; accumulation stays f32.
    acc = jnp.dot(x1_ref[...], wf1_ref[...],
                  preferred_element_type=jnp.float32)
    acc = acc + jnp.dot(x2_ref[...], wf2_ref[...],
                        preferred_element_type=jnp.float32)
    o_ref[...] = (acc + bf_ref[...]).astype(o_ref.dtype)


def multi_input_model(x1, x2, params, tb=None, stream_dtype=None):
    """params: w1 (784,128), b1 (1,128), w2, b2, w3 (256,2), b3 (1,2).

    Weights are stored transposed vs. torch (in_features, out_features), so the
    math is x @ W + b and concat([h1, h2]) @ W3 == h1 @ W3[:128] + h2 @ W3[128:].
    """
    w1, b1 = params["w1"], params["b1"]
    w2, b2 = params["w2"], params["b2"]
    w3, b3 = params["w3"], params["b3"]
    w3a, w3b = w3[:HIDDEN, :], w3[HIDDEN:, :]

    # Exact affine fold of the head into the branch weights (tiny precompute).
    wf1 = (w1 @ w3a).astype(jnp.float32)                    # (784, 2)
    wf2 = (w2 @ w3b).astype(jnp.float32)                    # (784, 2)
    bf = (b1 @ w3a + b2 @ w3b + b3).astype(jnp.float32)     # (1, 2)

    if stream_dtype is not None and x1.dtype != stream_dtype:
        # Opt-in: halves HBM traffic for the dominant x streams when the cast
        # fuses into the producer (or inputs are already narrow).
        x1 = x1.astype(stream_dtype)
        x2 = x2.astype(stream_dtype)

    B = x1.shape[0]
    tb = _choose_tile(B) if tb is None else _normalize_tile(B, tb)
    grid = (_cdiv(B, tb),)   # partial edge block instead of padding the inputs

    # Streamed activation tiles (double-buffered by Pallas).
    x_spec = pl.BlockSpec((tb, IN_FEATURES), lambda i: (i, 0))
    # Folded parameters: constant index -> DMAed once, resident across steps.
    wf_spec = pl.BlockSpec((IN_FEATURES, OUT_FEATURES), lambda i: (0, 0))
    bf_spec = pl.BlockSpec((1, OUT_FEATURES), lambda i: (0, 0))
    o_spec = pl.BlockSpec((tb, OUT_FEATURES), lambda i: (i, 0))

    out = pl.pallas_call(
        _fused_kernel,
        out_shape=jax.ShapeDtypeStruct((B, OUT_FEATURES), jnp.float32),
        grid=grid,
        in_specs=[x_spec, x_spec, wf_spec, wf_spec, bf_spec],
        out_specs=o_spec,
        compiler_params=pltpu.CompilerParams(
            dimension_semantics=("parallel",),
            vmem_limit_bytes=32 << 20,
        ),
    )(x1, x2, wf1, wf2, bf)
    return out


def init_params(key):
    """Deterministic init; mirrors torch nn.Linear shapes (stored transposed)."""
    k1, k2, k3, k4, k5, k6 = jax.random.split(key, 6)
    scale1 = 1.0 / jnp.sqrt(IN_FEATURES)
    scale3 = 1.0 / jnp.sqrt(2 * HIDDEN)
    return {
        "w1": jax.random.uniform(k1, (IN_FEATURES, HIDDEN), jnp.float32,
                                 -scale1, scale1),
        "b1": jax.random.uniform(k2, (1, HIDDEN), jnp.float32, -scale1, scale1),
        "w2": jax.random.uniform(k3, (IN_FEATURES, HIDDEN), jnp.float32,
                                 -scale1, scale1),
        "b2": jax.random.uniform(k4, (1, HIDDEN), jnp.float32, -scale1, scale1),
        "w3": jax.random.uniform(k5, (2 * HIDDEN, OUT_FEATURES), jnp.float32,
                                 -scale3, scale3),
        "b3": jax.random.uniform(k6, (1, OUT_FEATURES), jnp.float32,
                                 -scale3, scale3),
    }


def reference(x1, x2, params):
    """Unfused two-stage reference matching the torch module exactly."""
    h1 = x1 @ params["w1"] + params["b1"]
    h2 = x2 @ params["w2"] + params["b2"]
    h = jnp.concatenate([h1, h2], axis=1)
    return h @ params["w3"] + params["b3"]


if __name__ == "__main__":
    key = jax.random.PRNGKey(0)
    kp, kx1, kx2, ky1, ky2 = jax.random.split(key, 5)
    params = init_params(kp)

    # Primary check (original test shapes): B=2, f32 streaming, tight tolerance.
    B = 2
    x1 = jax.random.normal(kx1, (B, IN_FEATURES), jnp.float32)
    x2 = jax.random.normal(kx2, (B, IN_FEATURES), jnp.float32)
    out = jax.block_until_ready(multi_input_model(x1, x2, params))
    ref = reference(x1, x2, params)
    assert out.shape == (B, OUT_FEATURES)
    assert jnp.allclose(out, ref, atol=2e-4, rtol=1e-3), "f32 path mismatch"

    # Multi-step grid + ragged partial edge block + bf16 activation streaming.
    B2 = 20
    y1 = jax.random.normal(ky1, (B2, IN_FEATURES), jnp.float32)
    y2 = jax.random.normal(ky2, (B2, IN_FEATURES), jnp.float32)
    out2 = jax.block_until_ready(
        multi_input_model(y1, y2, params, tb=8, stream_dtype=jnp.bfloat16))
    ref2 = reference(y1, y2, params)
    assert out2.shape == (B2, OUT_FEATURES)
    assert jnp.allclose(out2, ref2, atol=2e-2, rtol=2e-2), "bf16 path mismatch"

    # Default tile selection on a mid-size ragged batch (exercises >=2 steps).
    out3 = jax.block_until_ready(multi_input_model(y1, y2, params))
    assert jnp.allclose(out3, ref2, atol=2e-4, rtol=1e-3), "default-tile mismatch"

    print("KERNEL_OK")
</pallas_src>

<mosaic_0001>
module attributes {stable_mosaic.version = 11 : i64} {
  func.func @_fused_kernel(%arg0: i32, %arg1: memref<2x784xf32, #tpu.memory_space<vmem>>, %arg2: memref<2x784xf32, #tpu.memory_space<vmem>>, %arg3: memref<784x2xf32, #tpu.memory_space<vmem>>, %arg4: memref<784x2xf32, #tpu.memory_space<vmem>>, %arg5: memref<1x2xf32, #tpu.memory_space<vmem>>, %arg6: memref<2x2xf32, #tpu.memory_space<vmem>>) attributes {dimension_semantics = [#tpu.dimension_semantics<parallel>], iteration_bounds = array<i64: 1>, scalar_prefetch = 0 : i64, scratch_operands = 0 : i64, tpu.core_type = #tpu.core_type<tc>, window_params = [{transform_indices = @transform_0, window_bounds = array<i64: 2, 784>}, {transform_indices = @transform_1, window_bounds = array<i64: 2, 784>}, {pipeline_mode = #tpu.pipeline_mode<synchronous>, transform_indices = @transform_2, window_bounds = array<i64: 784, 2>}, {pipeline_mode = #tpu.pipeline_mode<synchronous>, transform_indices = @transform_3, window_bounds = array<i64: 784, 2>}, {pipeline_mode = #tpu.pipeline_mode<synchronous>, transform_indices = @transform_4, window_bounds = array<i64: 1, 2>}, {transform_indices = @transform_5, window_bounds = array<i64: 2, 2>}]} {
    %c0 = arith.constant 0 : index
    %c0_0 = arith.constant 0 : index
    %0 = vector.load %arg1[%c0, %c0_0] : memref<2x784xf32, #tpu.memory_space<vmem>>, vector<2x784xf32>
    %c0_1 = arith.constant 0 : index
    %c0_2 = arith.constant 0 : index
    %1 = vector.load %arg3[%c0_1, %c0_2] : memref<784x2xf32, #tpu.memory_space<vmem>>, vector<784x2xf32>
    %cst = arith.constant dense<0.000000e+00> : vector<2x2xf32>
    %2 = tpu.matmul %0, %1, %cst {dimension_numbers = #tpu.dot_dimension_numbers<[1], [0], [0], [1], [0, 0, 1, 1], [], []>} : vector<2x784xf32>, vector<784x2xf32>, vector<2x2xf32> -> vector<2x2xf32>
    %c0_3 = arith.constant 0 : index
    %c0_4 = arith.constant 0 : index
    %3 = vector.load %arg2[%c0_3, %c0_4] : memref<2x784xf32, #tpu.memory_space<vmem>>, vector<2x784xf32>
    %c0_5 = arith.constant 0 : index
    %c0_6 = arith.constant 0 : index
    %4 = vector.load %arg4[%c0_5, %c0_6] : memref<784x2xf32, #tpu.memory_space<vmem>>, vector<784x2xf32>
    %cst_7 = arith.constant dense<0.000000e+00> : vector<2x2xf32>
    %5 = tpu.matmul %3, %4, %cst_7 {dimension_numbers = #tpu.dot_dimension_numbers<[1], [0], [0], [1], [0, 0, 1, 1], [], []>} : vector<2x784xf32>, vector<784x2xf32>, vector<2x2xf32> -> vector<2x2xf32>
    %6 = arith.addf %2, %5 : vector<2x2xf32>
    %c0_8 = arith.constant 0 : index
    %c0_9 = arith.constant 0 : index
    %7 = vector.load %arg5[%c0_8, %c0_9] : memref<1x2xf32, #tpu.memory_space<vmem>>, vector<1x2xf32>
    %8 = vector.broadcast %7 : vector<1x2xf32> to vector<2x2xf32>
    %9 = arith.addf %6, %8 : vector<2x2xf32>
    %c0_10 = arith.constant 0 : index
    %c0_11 = arith.constant 0 : index
    %10 = vector.load %arg6[%c0_10, %c0_11] : memref<2x2xf32, #tpu.memory_space<vmem>>, vector<2x2xf32>
    tpu.vector_store %arg6[%c0_10, %c0_11], %9 {strides = array<i32>} : memref<2x2xf32, #tpu.memory_space<vmem>>, vector<2x2xf32>,
    return
  }
  func.func @transform_0(%arg0: i32) -> (i32, i32) {
    %c0_i32 = arith.constant 0 : i32
    %c0_i32_0 = arith.constant 0 : i32
    return %arg0, %c0_i32 : i32, i32
  }
  func.func @transform_1(%arg0: i32) -> (i32, i32) {
    %c0_i32 = arith.constant 0 : i32
    %c0_i32_0 = arith.constant 0 : i32
    return %arg0, %c0_i32 : i32, i32
  }
  func.func @transform_2(%arg0: i32) -> (i32, i32) {
    %c0_i32 = arith.constant 0 : i32
    %c0_i32_0 = arith.constant 0 : i32
    %c0_i32_1 = arith.constant 0 : i32
    return %c0_i32, %c0_i32_0 : i32, i32
  }
  func.func @transform_3(%arg0: i32) -> (i32, i32) {
    %c0_i32 = arith.constant 0 : i32
    %c0_i32_0 = arith.constant 0 : i32
    %c0_i32_1 = arith.constant 0 : i32
    return %c0_i32, %c0_i32_0 : i32, i32
  }
  func.func @transform_4(%arg0: i32) -> (i32, i32) {
    %c0_i32 = arith.constant 0 : i32
    %c0_i32_0 = arith.constant 0 : i32
    %c0_i32_1 = arith.constant 0 : i32
    return %c0_i32, %c0_i32_0 : i32, i32
  }
  func.func @transform_5(%arg0: i32) -> (i32, i32) {
    %c0_i32 = arith.constant 0 : i32
    %c0_i32_0 = arith.constant 0 : i32
    return %arg0, %c0_i32 : i32, i32
  }
}

</mosaic_0001>

<bundles_post_ra>
// kernel: tpu_custom_call.1
= control target key start
LH: loop header
LB: loop body
LE: loop exit
PB: predicated region body
PF: predicated region fallthrough
CT: control target
= control target key end

     0   :  { %v1356_v47 = vmov 1983009808   ;;  %v227_v49 = vlaneseq  ;;  %vm1358_vm0 = vmmov 0   ;;  %vm262_vm1 = vcmask 130048   ;;  %s2054_s0 = inlined_call_operand.vmem [shape: f32[2,784], index: 0, kind: input, shape index: {}]   ;;  %s2055_s1 = inlined_call_operand.vmem [shape: f32[2,784], index: 1, kind: input, shape index: {}]   ;;  %s2056_s2 = inlined_call_operand.vmem [shape: f32[784,2], index: 2, kind: input, shape index: {}]   ;;  %s2057_s3 = inlined_call_operand.vmem [shape: f32[784,2], index: 3, kind: input, shape index: {}]   ;;  %s2058_s4 = inlined_call_operand.vmem [shape: f32[1,2], index: 4, kind: input, shape index: {}]   ;;  %s2059_s5 = inlined_call_operand.hbm [shape: f32[2,2], index: 5, kind: output, shape index: {}]  }
   0x1   :  { %v139_v0 = vld [vmem:[%s2057_s3 + $0x80] sm:$0xff]  ;;  %v140_v1 = vld [vmem:[%s2057_s3 + $0x88] sm:$0xff]  ;;  %v141_v11 = vld [vmem:[%s2057_s3 + $0x90] sm:$0xff]  ;;  %v225_v48 = vunpack.c.l.s4 %v1356_v47 }
   0x2   :  { %v171_v2 = vld [vmem:[%s2057_s3 + $0x180] sm:$0xff]  ;;  %v1125_v3 = vpack.c.bf16 %v140_v1, %v139_v0  ;;  %v172_v4 = vld [vmem:[%s2057_s3 + $0x188] sm:$0xff]  ;;  %v142_v13 = vld [vmem:[%s2057_s3 + $0x98] sm:$0xff]  ;;  %v228_v0 = vshrl.u32 %v227_v49, 7 }
   0x3   :  { %v123_v5 = vld [vmem:[%s2057_s3] sm:$0xff]  ;;  %v124_v6 = vld [vmem:[%s2057_s3 + $0x8] sm:$0xff]  ;;  %v1157_v7 = vpack.c.bf16 %v172_v4, %v171_v2  ;;  %v173_v14 = vld [vmem:[%s2057_s3 + $0x190] sm:$0xff]  ;;  %v1129_v16 = vpack.c.bf16 %v142_v13, %v141_v11  ;;  %v226_v63 = vunpack.c.0.s8 %v225_v48 }
   0x4   :  { %v1127_v8 = vpack.c.bf16 %v124_v6, %v123_v5  ;;  %v155_v9 = vld [vmem:[%s2057_s3 + $0x100] sm:$0xff]  ;;  %v156_v10 = vld [vmem:[%s2057_s3 + $0x108] sm:$0xff]  ;;  %1126 = vmatprep.subr.bf16.mxu0 %v1125_v3  ;;  %v174_v15 = vld [vmem:[%s2057_s3 + $0x198] sm:$0xff] }
   0x5   :  { %v1159_v12 = vpack.c.bf16 %v156_v10, %v155_v9  ;;  %1158 = vmatprep.subr.bf16.mxu1 %v1157_v7  ;;  %v1161_v17 = vpack.c.bf16 %v174_v15, %v173_v14  ;;  %v125_v18 = vld [vmem:[%s2057_s3 + $0x10] sm:$0xff]  ;;  %v126_v19 = vld [vmem:[%s2057_s3 + $0x18] sm:$0xff]  ;;  %v143_v23 = vld [vmem:[%s2057_s3 + $0xa0] sm:$0xff]  ;;  %v1541_v13 = vsub.s32 %v226_v63, %v228_v0  ;;  %v1357_v63 = vmov 0.0|0.0  }
   0x6   :  { %1128 = vmatpush3.bf16.msra.mxu0 %v1127_v8  ;;  %v157_v20 = vld [vmem:[%s2057_s3 + $0x110] sm:$0xff]  ;;  %v1131_v21 = vpack.c.bf16 %v126_v19, %v125_v18  ;;  %v158_v22 = vld [vmem:[%s2057_s3 + $0x118] sm:$0xff]  ;;  %v144_v24 = vld [vmem:[%s2057_s3 + $0xa8] sm:$0xff] }
   0x7   :  { %1160 = vmatpush3.bf16.msra.mxu1 %v1159_v12  ;;  %1130 = vmatprep.subr.bf16.mxu0 %v1129_v16  ;;  %v1163_v25 = vpack.c.bf16 %v158_v22, %v157_v20  ;;  %v1133_v26 = vpack.c.bf16 %v144_v24, %v143_v23  ;;  %v175_v27 = vld [vmem:[%s2057_s3 + $0x1a0] sm:$0xff]  ;;  %v176_v28 = vld [vmem:[%s2057_s3 + $0x1a8] sm:$0xff]  ;;  %v145_v35 = vld [vmem:[%s2057_s3 + $0xb0] sm:$0xff] }
   0x8   :  { %1162 = vmatprep.subr.bf16.mxu1 %v1161_v17  ;;  %v127_v29 = vld [vmem:[%s2057_s3 + $0x20] sm:$0xff]  ;;  %v1165_v30 = vpack.c.bf16 %v176_v28, %v175_v27  ;;  %v128_v31 = vld [vmem:[%s2057_s3 + $0x28] sm:$0xff]  ;;  %v146_v36 = vld [vmem:[%s2057_s3 + $0xb8] sm:$0xff] }
   0x9   :  { %v159_v32 = vld [vmem:[%s2057_s3 + $0x120] sm:$0xff]  ;;  %v160_v33 = vld [vmem:[%s2057_s3 + $0x128] sm:$0xff]  ;;  %v1135_v34 = vpack.c.bf16 %v128_v31, %v127_v29  ;;  %v177_v37 = vld [vmem:[%s2057_s3 + $0x1b0] sm:$0xff]  ;;  %v1137_v39 = vpack.c.bf16 %v146_v36, %v145_v35 }
   0xa   :  { %1132 = vmatpush3.bf16.msra.mxu0 %v1131_v21  ;;  %v1167_v38 = vpack.c.bf16 %v160_v33, %v159_v32  ;;  %v178_v40 = vld [vmem:[%s2057_s3 + $0x1b8] sm:$0xff]  ;;  %v129_v41 = vld [vmem:[%s2057_s3 + $0x30] sm:$0xff]  ;;  %v147_v46 = vld [vmem:[%s2057_s3 + $0xc0] sm:$0xff] }
   0xb   :  { %1164 = vmatpush3.bf16.msra.mxu1 %v1163_v25  ;;  %1134 = vmatprep.subr.bf16.mxu0 %v1133_v26  ;;  %v130_v42 = vld [vmem:[%s2057_s3 + $0x38] sm:$0xff]  ;;  %v1169_v43 = vpack.c.bf16 %v178_v40, %v177_v37  ;;  %v161_v44 = vld [vmem:[%s2057_s3 + $0x130] sm:$0xff]  ;;  %v148_v50 = vld [vmem:[%s2057_s3 + $0xc8] sm:$0xff] }
   0xc   :  { %1166 = vmatprep.subr.bf16.mxu1 %v1165_v30  ;;  %v162_v45 = vld [vmem:[%s2057_s3 + $0x138] sm:$0xff]  ;;  %v179_v51 = vld [vmem:[%s2057_s3 + $0x1c0] sm:$0xff]  ;;  %v180_v52 = vld [vmem:[%s2057_s3 + $0x1c8] sm:$0xff]  ;;  %v1139_v53 = vpack.c.bf16 %v130_v42, %v129_v41  ;;  %v1141_v55 = vpack.c.bf16 %v148_v50, %v147_v46 }
   0xd   :  { %v1171_v54 = vpack.c.bf16 %v162_v45, %v161_v44  ;;  %v131_v56 = vld [vmem:[%s2057_s3 + $0x40] sm:$0xff]  ;;  %v132_v57 = vld [vmem:[%s2057_s3 + $0x48] sm:$0xff]  ;;  %v1173_v59 = vpack.c.bf16 %v180_v52, %v179_v51  ;;  %v149_v61 = vld [vmem:[%s2057_s3 + $0xd0] sm:$0xff] }
   0xe   :  { %1136 = vmatpush3.bf16.msra.mxu0 %v1135_v34  ;;  %v163_v58 = vld [vmem:[%s2057_s3 + $0x140] sm:$0xff]  ;;  %v164_v60 = vld [vmem:[%s2057_s3 + $0x148] sm:$0xff]  ;;  %v150_v62 = vld [vmem:[%s2057_s3 + $0xd8] sm:$0xff]  ;;  %v1143_v3 = vpack.c.bf16 %v132_v57, %v131_v56 }
   0xf   :  { %1168 = vmatpush3.bf16.msra.mxu1 %v1167_v38  ;;  %1138 = vmatprep.subr.bf16.mxu0 %v1137_v39  ;;  %v181_v1 = vld [vmem:[%s2057_s3 + $0x1d0] sm:$0xff]  ;;  %v182_v2 = vld [vmem:[%s2057_s3 + $0x1d8] sm:$0xff]  ;;  %v1175_v4 = vpack.c.bf16 %v164_v60, %v163_v58  ;;  %v1145_v5 = vpack.c.bf16 %v150_v62, %v149_v61  ;;  %v151_v11 = vld [vmem:[%s2057_s3 + $0xe0] sm:$0xff] }
  0x10   :  { %1170 = vmatprep.subr.bf16.mxu1 %v1169_v43  ;;  %v133_v6 = vld [vmem:[%s2057_s3 + $0x50] sm:$0xff]  ;;  %v134_v7 = vld [vmem:[%s2057_s3 + $0x58] sm:$0xff]  ;;  %v1177_v9 = vpack.c.bf16 %v182_v2, %v181_v1  ;;  %v152_v12 = vld [vmem:[%s2057_s3 + $0xe8] sm:$0xff] }
  0x11   :  { %v165_v8 = vld [vmem:[%s2057_s3 + $0x150] sm:$0xff]  ;;  %v166_v10 = vld [vmem:[%s2057_s3 + $0x158] sm:$0xff]  ;;  %v183_v14 = vld [vmem:[%s2057_s3 + $0x1e0] sm:$0xff]  ;;  %v1147_v16 = vpack.c.bf16 %v134_v7, %v133_v6  ;;  %v1149_v19 = vpack.c.bf16 %v152_v12, %v151_v11 }
  0x12   :  { %1140 = vmatpush3.bf16.msra.mxu0 %v1139_v53  ;;  %v184_v15 = vld [vmem:[%s2057_s3 + $0x1e8] sm:$0xff]  ;;  %v135_v17 = vld [vmem:[%s2057_s3 + $0x60] sm:$0xff]  ;;  %v1179_v18 = vpack.c.bf16 %v166_v10, %v165_v8  ;;  %v153_v25 = vld [vmem:[%s2057_s3 + $0xf0] sm:$0xff]  ;;  %v1359_v10 = vmov 0.0  }
  0x13   :  { %1172 = vmatpush3.bf16.msra.mxu1 %v1171_v54  ;;  %1142 = vmatprep.subr.bf16.mxu0 %v1141_v55  ;;  %v136_v20 = vld [vmem:[%s2057_s3 + $0x68] sm:$0xff]  ;;  %v167_v21 = vld [vmem:[%s2057_s3 + $0x160] sm:$0xff]  ;;  %v1181_v23 = vpack.c.bf16 %v184_v15, %v183_v14  ;;  %v154_v26 = vld [vmem:[%s2057_s3 + $0xf8] sm:$0xff] }
  0x14   :  { %1174 = vmatprep.subr.bf16.mxu1 %v1173_v59  ;;  %v121_v22 = vld [vmem:[%s2055_s1] sm:$0xff]  ;;  %v168_v24 = vld [vmem:[%s2057_s3 + $0x168] sm:$0xff]  ;;  %v185_v29 = vld [vmem:[%s2057_s3 + $0x1f0] sm:$0xff]  ;;  %v1151_v31 = vpack.c.bf16 %v136_v20, %v135_v17  ;;  %v1153_v35 = vpack.c.bf16 %v154_v26, %v153_v25 }
  0x15   :  { %v230_v27 = vrot.slane %v121_v22, %v1541_v13  ;;  %v223_v28 = vcombine.high %v121_v22, %v121_v22  ;;  %v186_v30 = vld [vmem:[%s2057_s3 + $0x1f8] sm:$0xff]  ;;  %v1183_v34 = vpack.c.bf16 %v168_v24, %v167_v21  ;;  %v137_v36 = vld [vmem:[%s2057_s3 + $0x70] sm:$0xff]  ;;  %v203_v42 = vld [vmem:[%s2057_s3 + $0x280] sm:$0xff] }
  0x16   :  { %1144 = vmatpush3.bf16.msra.mxu0 %v1143_v3  ;;  %v138_v37 = vld [vmem:[%s2057_s3 + $0x78] sm:$0xff]  ;;  %v169_v38 = vld [vmem:[%s2057_s3 + $0x170] sm:$0xff]  ;;  %v1185_v39 = vpack.c.bf16 %v186_v30, %v185_v29  ;;  %v204_v43 = vld [vmem:[%s2057_s3 + $0x288] sm:$0xff] }
  0x17   :  { %1176 = vmatpush3.bf16.msra.mxu1 %v1175_v4  ;;  %1146 = vmatprep.subr.bf16.mxu0 %v1145_v5  ;;  %v238_v32 = vcombine.high %v230_v27, %v230_v27  ;;  %v237_v33 = vrot.slane %v223_v28, %v1541_v13  ;;  %v170_v40 = vld [vmem:[%s2057_s3 + $0x178] sm:$0xff]  ;;  %v1155_v44 = vpack.c.bf16 %v138_v37, %v137_v36  ;;  %v187_v47 = vld [vmem:[%s2057_s3 + $0x200] sm:$0xff]  ;;  %v188_v48 = vld [vmem:[%s2057_s3 + $0x208] sm:$0xff] }
  0x18   :  { %1178 = vmatprep.subr.bf16.mxu1 %v1177_v9  ;;  %v1187_v45 = vpack.c.bf16 %v170_v40, %v169_v38  ;;  %v1189_v46 = vpack.c.bf16 %v204_v43, %v203_v42  ;;  %v122_v49 = vld [vmem:[%s2055_s1 + $0x8] sm:$0x3f]  ;;  %v219_v50 = vld [vmem:[%s2057_s3 + $0x300] sm:$0xff]  ;;  %v205_v52 = vld [vmem:[%s2057_s3 + $0x290] sm:$0xff]  ;;  %v1191_v57 = vpack.c.bf16 %v188_v48, %v187_v47 }
  0x19   :  { %329 = vmatprep.mubr.f32.mxu0 %v238_v32  ;;  %v239_v41 = vcombine.high %v237_v33, %v237_v33  ;;  %v220_v51 = vld [vmem:[%s2057_s3 + $0x308] sm:$0xff]  ;;  %v206_v53 = vld [vmem:[%s2057_s3 + $0x298] sm:$0xff]  ;;  %v39_v54 = vld [vmem:[%s2056_s2 + $0x80] sm:$0xff]  ;;  %v1624_v56 = vrot.slane %v122_v49, %v1541_v13  ;;  %v240_v58 = vcombine.high %v122_v49, %v122_v49 }
  0x1a   :  { %1148 = vmatpush3.bf16.msra.mxu0 %v1147_v16  ;;  %v40_v55 = vld [vmem:[%s2056_s2 + $0x88] sm:$0xff]  ;;  %v1222_v59 = vpack.c.bf16 %v220_v51, %v219_v50  ;;  %v189_v60 = vld [vmem:[%s2057_s3 + $0x210] sm:$0xff]  ;;  %v190_v61 = vld [vmem:[%s2057_s3 + $0x218] sm:$0xff]  ;;  %v1193_v0 = vpack.c.bf16 %v206_v53, %v205_v52 }
  0x1b   :  { %1180 = vmatpush3.bf16.msra.mxu1 %v1179_v18  ;;  %1150 = vmatprep.subr.bf16.mxu0 %v1149_v19  ;;  %v23_v62 = vld [vmem:[%s2056_s2] sm:$0xff]  ;;  %v1224_v1 = vpack.c.bf16 %v40_v55, %v39_v54  ;;  %v24_v2 = vld [vmem:[%s2056_s2 + $0x8] sm:$0xff]  ;;  %v41_v5 = vld [vmem:[%s2056_s2 + $0x90] sm:$0xff]  ;;  %v255_v7 = vcombine.high %v1624_v56, %v1624_v56  ;;  %v254_v8 = vrot.slane %v240_v58, %v1541_v13 }
  0x1c   :  { %1182 = vmatprep.subr.bf16.mxu1 %v1181_v23  ;;  %399 = vmatprep.mubr.f32.mxu1 %v239_v41  ;;  %v207_v3 = vld [vmem:[%s2057_s3 + $0x2a0] sm:$0xff]  ;;  %v208_v4 = vld [vmem:[%s2057_s3 + $0x2a8] sm:$0xff]  ;;  %v42_v6 = vld [vmem:[%s2056_s2 + $0x98] sm:$0xff]  ;;  %v1195_v9 = vpack.c.bf16 %v190_v61, %v189_v60  ;;  %v1226_v11 = vpack.c.bf16 %v24_v2, %v23_v62 }
  0x1d   :  { %v1197_v12 = vpack.c.bf16 %v208_v4, %v207_v3  ;;  %v191_v14 = vld [vmem:[%s2057_s3 + $0x220] sm:$0xff]  ;;  %v192_v15 = vld [vmem:[%s2057_s3 + $0x228] sm:$0xff]  ;;  %v25_v16 = vld [vmem:[%s2056_s2 + $0x10] sm:$0xff]  ;;  %v1228_v17 = vpack.c.bf16 %v42_v6, %v41_v5 }
  0x1e   :  { %1152 = vmatpush3.bf16.msra.mxu0 %v1151_v31  ;;  %v26_v18 = vld [vmem:[%s2056_s2 + $0x18] sm:$0xff]  ;;  %v209_v19 = vld [vmem:[%s2057_s3 + $0x2b0] sm:$0xff]  ;;  %v43_v21 = vld [vmem:[%s2056_s2 + $0xa0] sm:$0xff]  ;;  %v1199_v23 = vpack.c.bf16 %v192_v15, %v191_v14 }
  0x1f   :  { %1184 = vmatpush3.bf16.msra.mxu1 %v1183_v34  ;;  %1154 = vmatprep.subr.bf16.mxu0 %v1153_v35  ;;  %v210_v20 = vld [vmem:[%s2057_s3 + $0x2b8] sm:$0xff]  ;;  %v44_v22 = vld [vmem:[%s2056_s2 + $0xa8] sm:$0xff]  ;;  %v1230_v24 = vpack.c.bf16 %v26_v18, %v25_v16  ;;  %v193_v26 = vld [vmem:[%s2057_s3 + $0x230] sm:$0xff] }
  0x20   :  { %1186 = vmatprep.subr.bf16.mxu1 %v1185_v39  ;;  %v1201_v25 = vpack.c.bf16 %v210_v20, %v209_v19  ;;  %v27_v28 = vld [vmem:[%s2056_s2 + $0x20] sm:$0xff]  ;;  %v1232_v29 = vpack.c.bf16 %v44_v22, %v43_v21  ;;  %v28_v30 = vld [vmem:[%s2056_s2 + $0x28] sm:$0xff]  ;;  %v46_v34 = vld [vmem:[%s2056_s2 + $0xb8] sm:$0xff] }
  0x21   :  { %v211_v31 = vld [vmem:[%s2057_s3 + $0x2c0] sm:$0xff]  ;;  %v212_v32 = vld [vmem:[%s2057_s3 + $0x2c8] sm:$0xff]  ;;  %v1234_v37 = vpack.c.bf16 %v28_v30, %v27_v28  ;;  %v29_v40 = vld [vmem:[%s2056_s2 + $0x30] sm:$0xff] }
  0x22   :  { %1156 = vmatpush3.bf16.msra.mxu0 %v1155_v44  ;;  %v195_v36 = vld [vmem:[%s2057_s3 + $0x240] sm:$0xff]  ;;  %v1205_v38 = vpack.c.bf16 %v212_v32, %v211_v31  ;;  %v196_v39 = vld [vmem:[%s2057_s3 + $0x248] sm:$0xff]  ;;  %v30_v43 = vld [vmem:[%s2056_s2 + $0x38] sm:$0xff] }
  0x23   :  { %1188 = vmatpush3.bf16.msra.mxu1 %v1187_v45  ;;  %1190 = vmatprep.subr.bf16.mxu0 %v1189_v46  ;;  %v1717_v41 = vld [vmem:[%s2054_s0] sm:$0xff]  ;;  %v213_v44 = vld [vmem:[%s2057_s3 + $0x2d0] sm:$0xff]  ;;  %v214_v45 = vld [vmem:[%s2057_s3 + $0x2d8] sm:$0xff]  ;;  %v1207_v49 = vpack.c.bf16 %v196_v39, %v195_v36  ;;  %v1238_v51 = vpack.c.bf16 %v30_v43, %v29_v40 }
  0x24   :  { %1221 = vmatprep.subr.bf16.mxu1 %v1357_v63  ;;  %v1730_v46 = vrot.slane %v1717_v41, %v1541_v13  ;;  %v47_v47 = vld [vmem:[%s2056_s2 + $0xc0] sm:$0xff]  ;;  %v48_v48 = vld [vmem:[%s2056_s2 + $0xc8] sm:$0xff]  ;;  %v1209_v52 = vpack.c.bf16 %v214_v45, %v213_v44  ;;  %v197_v53 = vld [vmem:[%s2057_s3 + $0x250] sm:$0xff]  ;;  %v547_v15 = vcombine.high %v1717_v41, %v1717_v41 }
  0x25   :  { %330 = vmatmul.mubr.f32.vlgmr.msra.gmra.mrb[0].mxu0 %v230_v27  ;;  %v194_v27 = vld [vmem:[%s2057_s3 + $0x238] sm:$0xff]  ;;  %v31_v55 = vld [vmem:[%s2056_s2 + $0x40] sm:$0xff]  ;;  %v32_v58 = vld [vmem:[%s2056_s2 + $0x48] sm:$0xff] }
  0x26   :  { %400 = vmatmul.mubr.f32.vlgmr.msra.gmra.mrb[0].mxu1 %v237_v33  ;;  %1192 = vmatpush3.bf16.msra.mxu0 %v1191_v57  ;;  %v45_v33 = vld [vmem:[%s2056_s2 + $0xb0] sm:$0xff]  ;;  %v1203_v35 = vpack.c.bf16 %v194_v27, %v193_v26  ;;  %v562_v50 = vcombine.high %v1730_v46, %v1730_v46  ;;  %v198_v54 = vld [vmem:[%s2057_s3 + $0x258] sm:$0xff]  ;;  %v1240_v57 = vpack.c.bf16 %v48_v48, %v47_v47  ;;  %v216_v60 = vld [vmem:[%s2057_s3 + $0x2e8] sm:$0xff] }
  0x27   :  { %1223 = vmatpush3.bf16.msra.mxu1 %v1222_v59  ;;  %1115 = vmatprep.mubr.msk.f32.mxu1 %vm1358_vm0, %v1359_v10  ;;  %v1236_v42 = vpack.c.bf16 %v46_v34, %v45_v33  ;;  %v215_v59 = vld [vmem:[%s2057_s3 + $0x2e0] sm:$0xff]  ;;  %v49_v61 = vld [vmem:[%s2056_s2 + $0xd0] sm:$0xff]  ;;  %v50_v62 = vld [vmem:[%s2056_s2 + $0xd8] sm:$0xff]  ;;  %v1815_v28 = vrot.slane %v547_v15, %v1541_v13 }
  0x28   :  { %1194 = vmatprep.subr.bf16.mxu0 %v1193_v0  ;;  %1225 = vmatprep.subr.bf16.mxu1 %v1224_v1  ;;  %v1211_v0 = vpack.c.bf16 %v198_v54, %v197_v53  ;;  %v1242_v1 = vpack.c.bf16 %v32_v58, %v31_v55  ;;  %v1213_v2 = vpack.c.bf16 %v216_v60, %v215_v59  ;;  %v199_v3 = vld [vmem:[%s2057_s3 + $0x260] sm:$0xff]  ;;  %v200_v4 = vld [vmem:[%s2057_s3 + $0x268] sm:$0xff]  ;;  %v33_v5 = vld [vmem:[%s2056_s2 + $0x50] sm:$0xff] }
  0x29   :  { %469 = vmatprep.mubr.f32.mxu0 %v255_v7  ;;  %v1244_v6 = vpack.c.bf16 %v50_v62, %v49_v61  ;;  %v34_v7 = vld [vmem:[%s2056_s2 + $0x58] sm:$0xff]  ;;  %v1215_v14 = vpack.c.bf16 %v200_v4, %v199_v3  ;;  %v201_v18 = vld [vmem:[%s2057_s3 + $0x270] sm:$0xff]  ;;  %v35_v20 = vld [vmem:[%s2056_s2 + $0x60] sm:$0xff]  ;;  %v563_v43 = vcombine.high %v1815_v28, %v1815_v28 }
  0x2a   :  { %1116 = vmatmul.mubr.msk.f32.vlgmr.msra.gmra.mrb[2].mxu1 %vm262_vm1, %v254_v8  ;;  %1196 = vmatpush3.bf16.msra.mxu0 %v1195_v9  ;;  %v217_v8 = vld [vmem:[%s2057_s3 + $0x2f0] sm:$0xff]  ;;  %v218_v9 = vld [vmem:[%s2057_s3 + $0x2f8] sm:$0xff]  ;;  %v1246_v16 = vpack.c.bf16 %v34_v7, %v33_v5  ;;  %v36_v22 = vld [vmem:[%s2056_s2 + $0x68] sm:$0xff] }
  0x2b   :  { %1227 = vmatpush3.bf16.msra.mxu1 %v1226_v11  ;;  %1198 = vmatprep.subr.bf16.mxu0 %v1197_v12  ;;  %v51_v11 = vld [vmem:[%s2056_s2 + $0xe0] sm:$0xff]  ;;  %v52_v12 = vld [vmem:[%s2056_s2 + $0xe8] sm:$0xff]  ;;  %v202_v19 = vld [vmem:[%s2057_s3 + $0x278] sm:$0xff] }
  0x2c   :  { %1229 = vmatprep.subr.bf16.mxu1 %v1228_v17  ;;  %652 = vmatprep.mubr.f32.mxu1 %v562_v50  ;;  %v1217_v17 = vpack.c.bf16 %v218_v9, %v217_v8  ;;  %v1248_v21 = vpack.c.bf16 %v52_v12, %v51_v11  ;;  %v54_v26 = vld [vmem:[%s2056_s2 + $0xf8] sm:$0xff]  ;;  %v1219_v27 = vpack.c.bf16 %v202_v19, %v201_v18  ;;  %v37_v31 = vld [vmem:[%s2056_s2 + $0x70] sm:$0xff]  ;;  %v55_v32 = vld [vmem:[%s2056_s2 + $0x100] sm:$0xff] }
  0x2d   :  { %v56_v33 = vld [vmem:[%s2056_s2 + $0x108] sm:$0xff]  ;;  %v73_v36 = vld [vmem:[%s2056_s2 + $0x190] sm:$0xff]  ;;  %v87_v47 = vld [vmem:[%s2056_s2 + $0x200] sm:$0xff] }
  0x2e   :  { %1200 = vmatpush3.bf16.msra.mxu0 %v1199_v23  ;;  %v71_v23 = vld [vmem:[%s2056_s2 + $0x180] sm:$0xff]  ;;  %v104_v39 = vld [vmem:[%s2056_s2 + $0x288] sm:$0xff]  ;;  %v1258_v40 = vpack.c.bf16 %v56_v33, %v55_v32  ;;  %v57_v41 = vld [vmem:[%s2056_s2 + $0x110] sm:$0xff] }
  0x2f   :  { %1231 = vmatpush3.bf16.msra.mxu1 %v1230_v24  ;;  %1202 = vmatprep.subr.bf16.mxu0 %v1201_v25  ;;  %v72_v24 = vld [vmem:[%s2056_s2 + $0x188] sm:$0xff]  ;;  %v53_v25 = vld [vmem:[%s2056_s2 + $0xf0] sm:$0xff] }
  0x30   :  { %1233 = vmatprep.subr.bf16.mxu1 %v1232_v29  ;;  %v1250_v29 = vpack.c.bf16 %v36_v22, %v35_v20  ;;  %v1256_v30 = vpack.c.bf16 %v72_v24, %v71_v23  ;;  %v1252_v34 = vpack.c.bf16 %v54_v26, %v53_v25  ;;  %v88_v48 = vld [vmem:[%s2056_s2 + $0x208] sm:$0xff] }
  0x32   :  { %1204 = vmatpush3.bf16.msra.mxu0 %v1203_v35  ;;  %v38_v35 = vld [vmem:[%s2056_s2 + $0x78] sm:$0xff] }
  0x33   :  { %1235 = vmatpush3.bf16.msra.mxu1 %v1234_v37  ;;  %1206 = vmatprep.subr.bf16.mxu0 %v1205_v38  ;;  %v74_v37 = vld [vmem:[%s2056_s2 + $0x198] sm:$0xff]  ;;  %v103_v38 = vld [vmem:[%s2056_s2 + $0x280] sm:$0xff]  ;;  %v1254_v44 = vpack.c.bf16 %v38_v35, %v37_v31 }
  0x34   :  { %1237 = vmatprep.subr.bf16.mxu1 %v1236_v42  ;;  %v58_v42 = vld [vmem:[%s2056_s2 + $0x118] sm:$0xff]  ;;  %v1260_v45 = vpack.c.bf16 %v74_v37, %v73_v36  ;;  %v1288_v50 = vpack.c.bf16 %v104_v39, %v103_v38 }
  0x36   :  { %1208 = vmatpush3.bf16.msra.mxu0 %v1207_v49  ;;  %v1858_v49 = vld [vmem:[%s2054_s0 + $0x8] sm:$0x3f] }
  0x37   :  { %1239 = vmatpush3.bf16.msra.mxu1 %v1238_v51  ;;  %1210 = vmatprep.subr.bf16.mxu0 %v1209_v52  ;;  %v75_v51 = vld [vmem:[%s2056_s2 + $0x1a0] sm:$0xff]  ;;  %v76_v52 = vld [vmem:[%s2056_s2 + $0x1a8] sm:$0xff]  ;;  %v1868_v53 = vrot.slane %v1858_v49, %v1541_v13 }
  0x38   :  { %1241 = vmatprep.subr.bf16.mxu1 %v1240_v57 }
  0x3a   :  { %1212 = vmatpush3.bf16.msra.mxu0 %v1211_v0 }
  0x3b   :  { %1243 = vmatpush3.bf16.msra.mxu1 %v1242_v1  ;;  %1214 = vmatprep.subr.bf16.mxu0 %v1213_v2 }
  0x3c   :  { %1245 = vmatprep.subr.bf16.mxu1 %v1244_v6 }
  0x3e   :  { %1216 = vmatpush3.bf16.msra.mxu0 %v1215_v14 }
  0x3f   :  { %1247 = vmatpush3.bf16.msra.mxu1 %v1246_v16  ;;  %1218 = vmatprep.subr.bf16.mxu0 %v1217_v17 }
  0x40   :  { %1249 = vmatprep.subr.bf16.mxu1 %v1248_v21 }
  0x42   :  { %1220 = vmatpush3.bf16.msra.mxu0 %v1219_v27 }
  0x43   :  { %1251 = vmatpush3.bf16.msra.mxu1 %v1250_v29  ;;  %1257 = vmatprep.subr.bf16.mxu0 %v1256_v30 }
  0x44   :  { %1253 = vmatprep.subr.bf16.mxu1 %v1252_v34 }
  0x45   :  { %10 = vsyncpa [#allocation3], 0  ;;  %470 = vmatmul.mubr.f32.vlgmr.msra.gmra.mrb[2].mxu0 %v1624_v56  ;;  %v105_v54 = vld [vmem:[%s2056_s2 + $0x290] sm:$0xff]  ;;  %v106_v55 = vld [vmem:[%s2056_s2 + $0x298] sm:$0xff]  ;;  %v1262_v57 = vpack.c.bf16 %v58_v42, %v57_v41  ;;  %v1290_v58 = vpack.c.bf16 %v88_v48, %v87_v47  ;;  %v1264_v59 = vpack.c.bf16 %v76_v52, %v75_v51  ;;  %v579_v3 = vcombine.high %v1868_v53, %v1868_v53  ;;  %s1360_s25 = smov [#allocation2]  }
  0x46   :  { %1259 = vmatpush3.bf16.msra.mxu0 %v1258_v40  ;;  %722 = vmatprep.mubr.f32.mxu0 %v563_v43  ;;  %v59_v60 = vld [vmem:[%s2056_s2 + $0x120] sm:$0xff]  ;;  %v60_v56 = vld [vmem:[%s2056_s2 + $0x128] sm:$0xff]  ;;  %v89_v61 = vld [vmem:[%s2056_s2 + $0x210] sm:$0xff]  ;;  %v1292_v62 = vpack.c.bf16 %v106_v55, %v105_v54  ;;  %s884_s3 = sshll.u32 %s1360_s25, 4  ;;  %vm876_vm2 = vcmask 9216   ;;  %s885_s3 = int_to_ptr.vmem [resolvable:$true] %s884_s3 }
  0x47   :  { %1255 = vmatpush3.bf16.msra.mxu1 %v1254_v44  ;;  %1261 = vmatprep.subr.bf16.mxu0 %v1260_v45  ;;  %v90_v0 = vld [vmem:[%s2056_s2 + $0x218] sm:$0xff]  ;;  %v77_v1 = vld [vmem:[%s2056_s2 + $0x1b0] sm:$0xff]  ;;  %v107_v4 = vld [vmem:[%s2056_s2 + $0x2a0] sm:$0xff]  ;;  %v1266_v6 = vpack.c.bf16 %v60_v56, %v59_v60  ;;  %s1332_s26 = scalar_lea.vmem %s885_s3, 32  ;;  %p1337_p1 = scmp.lt.s32.totalorder %s885_s3, %s885_s3 }
  0x48   :  { %1289 = vmatprep.subr.bf16.mxu1 %v1288_v50  ;;  %v78_v2 = vld [vmem:[%s2056_s2 + $0x1b8] sm:$0xff]  ;;  %v108_v5 = vld [vmem:[%s2056_s2 + $0x2a8] sm:$0xff]  ;;  %v1294_v7 = vpack.c.bf16 %v90_v0, %v89_v61  ;;  %v61_v9 = vld [vmem:[%s2056_s2 + $0x130] sm:$0xff]  ;;  %p1333_p0 = scmp.ne.s32.totalorder %s885_s3, %s1332_s26  ;;  %p1338_p2 = scmp.lt.s32.totalorder %s1332_s26, %s1332_s26 }
  0x49   :  { %v1268_v8 = vpack.c.bf16 %v78_v2, %v77_v1  ;;  %v62_v11 = vld [vmem:[%s2056_s2 + $0x138] sm:$0xff]  ;;  %v91_v12 = vld [vmem:[%s2056_s2 + $0x220] sm:$0xff]  ;;  %v92_v14 = vld [vmem:[%s2056_s2 + $0x228] sm:$0xff] }
  0x4a   :  { %653 = vmatmul.mubr.f32.vlgmr.msra.gmra.mrb[4].mxu1 %v1730_v46  ;;  %1263 = vmatpush3.bf16.msra.mxu0 %v1262_v57  ;;  %v1296_v46 = vpack.c.bf16 %v108_v5, %v107_v4  ;;  %v79_v15 = vld [vmem:[%s2056_s2 + $0x1c0] sm:$0xff]  ;;  %v80_v16 = vld [vmem:[%s2056_s2 + $0x1c8] sm:$0xff]  ;;  %v109_v17 = vld [vmem:[%s2056_s2 + $0x2b0] sm:$0xff]  ;;  %v1270_v19 = vpack.c.bf16 %v62_v11, %v61_v9  ;;  %v1298_v20 = vpack.c.bf16 %v92_v14, %v91_v12  ;;  %p1339_p3 = por %p1338_p2, %p1337_p1 }
  0x4b   :  { %1291 = vmatpush3.bf16.msra.mxu1 %v1290_v58  ;;  %1265 = vmatprep.subr.bf16.mxu0 %v1264_v59  ;;  %v110_v18 = vld [vmem:[%s2056_s2 + $0x2b8] sm:$0xff]  ;;  %v1272_v21 = vpack.c.bf16 %v80_v16, %v79_v15  ;;  %v63_v22 = vld [vmem:[%s2056_s2 + $0x140] sm:$0xff]  ;;  %v64_v23 = vld [vmem:[%s2056_s2 + $0x148] sm:$0xff]  ;;  %v564_v14 = vcombine.high %v1858_v49, %v1858_v49 }
  0x4c   :  { %1293 = vmatprep.subr.bf16.mxu1 %v1292_v62  ;;  %792 = vmatprep.mubr.f32.mxu1 %v579_v3  ;;  %v93_v24 = vld [vmem:[%s2056_s2 + $0x230] sm:$0xff]  ;;  %v1300_v25 = vpack.c.bf16 %v110_v18, %v109_v17  ;;  %v94_v26 = vld [vmem:[%s2056_s2 + $0x238] sm:$0xff]  ;;  %v111_v30 = vld [vmem:[%s2056_s2 + $0x2c0] sm:$0xff]  ;;  %v1274_v32 = vpack.c.bf16 %v64_v23, %v63_v22  ;;  %p1340_p4 = pnand %p1339_p3, %p1333_p0 }
  0x4d   :  { %v81_v27 = vld [vmem:[%s2056_s2 + $0x1d0] sm:$0xff]  ;;  %v82_v29 = vld [vmem:[%s2056_s2 + $0x1d8] sm:$0xff]  ;;  %v112_v31 = vld [vmem:[%s2056_s2 + $0x2c8] sm:$0xff]  ;;  %v1302_v33 = vpack.c.bf16 %v94_v26, %v93_v24  ;;  %v578_v17 = vrot.slane %v564_v14, %v1541_v13 }
  0x4e   :  { %1267 = vmatpush3.bf16.msra.mxu0 %v1266_v6  ;;  %v1276_v34 = vpack.c.bf16 %v82_v29, %v81_v27  ;;  %v65_v35 = vld [vmem:[%s2056_s2 + $0x150] sm:$0xff]  ;;  %v66_v36 = vld [vmem:[%s2056_s2 + $0x158] sm:$0xff]  ;;  %v95_v37 = vld [vmem:[%s2056_s2 + $0x240] sm:$0xff]  ;;  %v1304_v38 = vpack.c.bf16 %v112_v31, %v111_v30 }
  0x4f   :  { %1295 = vmatpush3.bf16.msra.mxu1 %v1294_v7  ;;  %1269 = vmatprep.subr.bf16.mxu0 %v1268_v8  ;;  %v96_v39 = vld [vmem:[%s2056_s2 + $0x248] sm:$0xff]  ;;  %v83_v40 = vld [vmem:[%s2056_s2 + $0x1e0] sm:$0xff]  ;;  %v113_v42 = vld [vmem:[%s2056_s2 + $0x2d0] sm:$0xff]  ;;  %v1278_v44 = vpack.c.bf16 %v66_v36, %v65_v35 }
  0x50   :  { %1297 = vmatprep.subr.bf16.mxu1 %v1296_v46  ;;  %v84_v41 = vld [vmem:[%s2056_s2 + $0x1e8] sm:$0xff]  ;;  %v114_v43 = vld [vmem:[%s2056_s2 + $0x2d8] sm:$0xff]  ;;  %v1306_v45 = vpack.c.bf16 %v96_v39, %v95_v37  ;;  %v67_v48 = vld [vmem:[%s2056_s2 + $0x160] sm:$0xff] }
  0x51   :  { %v1280_v47 = vpack.c.bf16 %v84_v41, %v83_v40  ;;  %v68_v50 = vld [vmem:[%s2056_s2 + $0x168] sm:$0xff]  ;;  %v97_v51 = vld [vmem:[%s2056_s2 + $0x250] sm:$0xff]  ;;  %v1308_v52 = vpack.c.bf16 %v114_v43, %v113_v42  ;;  %v98_v54 = vld [vmem:[%s2056_s2 + $0x258] sm:$0xff] }
  0x52   :  { %1271 = vmatpush3.bf16.msra.mxu0 %v1270_v19  ;;  %v85_v55 = vld [vmem:[%s2056_s2 + $0x1f0] sm:$0xff]  ;;  %v86_v57 = vld [vmem:[%s2056_s2 + $0x1f8] sm:$0xff]  ;;  %v115_v58 = vld [vmem:[%s2056_s2 + $0x2e0] sm:$0xff]  ;;  %v1282_v60 = vpack.c.bf16 %v68_v50, %v67_v48  ;;  %v1310_v56 = vpack.c.bf16 %v98_v54, %v97_v51 }
  0x53   :  { %1299 = vmatpush3.bf16.msra.mxu1 %v1298_v20  ;;  %1273 = vmatprep.subr.bf16.mxu0 %v1272_v21  ;;  %v116_v59 = vld [vmem:[%s2056_s2 + $0x2e8] sm:$0xff]  ;;  %v1284_v61 = vpack.c.bf16 %v86_v57, %v85_v55  ;;  %v69_v62 = vld [vmem:[%s2056_s2 + $0x170] sm:$0xff]  ;;  %v70_v0 = vld [vmem:[%s2056_s2 + $0x178] sm:$0xff] }
  0x54   :  { %1301 = vmatprep.subr.bf16.mxu1 %v1300_v25  ;;  %v1312_v1 = vpack.c.bf16 %v116_v59, %v115_v58  ;;  %v99_v2 = vld [vmem:[%s2056_s2 + $0x260] sm:$0xff]  ;;  %v100_v3 = vld [vmem:[%s2056_s2 + $0x268] sm:$0xff]  ;;  %v117_v4 = vld [vmem:[%s2056_s2 + $0x2f0] sm:$0xff]  ;;  %v1286_v6 = vpack.c.bf16 %v70_v0, %v69_v62 }
  0x55   :  { %v118_v5 = vld [vmem:[%s2056_s2 + $0x2f8] sm:$0xff]  ;;  %v1314_v7 = vpack.c.bf16 %v100_v3, %v99_v2  ;;  %v119_v8 = vld [vmem:[%s2056_s2 + $0x300] sm:$0xff]  ;;  %v120_v9 = vld [vmem:[%s2056_s2 + $0x308] sm:$0xff] }
  0x56   :  { %1275 = vmatpush3.bf16.msra.mxu0 %v1274_v32  ;;  %v1316_v11 = vpack.c.bf16 %v118_v5, %v117_v4  ;;  %v101_v12 = vld [vmem:[%s2056_s2 + $0x270] sm:$0xff]  ;;  %v102_v46 = vld [vmem:[%s2056_s2 + $0x278] sm:$0xff]  ;;  %v1321_v15 = vpack.c.bf16 %v120_v9, %v119_v8  ;;  %v894_v41 = vld [vmem:[%s2058_s4] ss:$0 sm:$0xff] }
  0x57   :  { %1303 = vmatpush3.bf16.msra.mxu1 %v1302_v33  ;;  %1277 = vmatprep.subr.bf16.mxu0 %v1276_v34  ;;  %v1318_v16 = vpack.c.bf16 %v102_v46, %v101_v12 }
  0x58   :  { %1305 = vmatprep.subr.bf16.mxu1 %v1304_v38 }
  0x5a   :  { %1279 = vmatpush3.bf16.msra.mxu0 %v1278_v44 }
  0x5b   :  { %1307 = vmatpush3.bf16.msra.mxu1 %v1306_v45  ;;  %1281 = vmatprep.subr.bf16.mxu0 %v1280_v47 }
  0x5c   :  { %1309 = vmatprep.subr.bf16.mxu1 %v1308_v52 }
  0x5e   :  { %1283 = vmatpush3.bf16.msra.mxu0 %v1282_v60 }
  0x5f   :  { %1311 = vmatpush3.bf16.msra.mxu1 %v1310_v56  ;;  %1285 = vmatprep.subr.bf16.mxu0 %v1284_v61 }
  0x60   :  { %1313 = vmatprep.subr.bf16.mxu1 %v1312_v1 }
  0x62   :  { %1287 = vmatpush3.bf16.msra.mxu0 %v1286_v6 }
  0x63   :  { %1315 = vmatpush3.bf16.msra.mxu1 %v1314_v7  ;;  %1320 = vmatprep.subr.bf16.mxu0 %v1357_v63 }
  0x64   :  { %1317 = vmatprep.subr.bf16.mxu1 %v1316_v11 }
  0x65   :  { %723 = vmatmul.mubr.f32.vlgmr.msra.gmra.mrb[4].mxu0 %v1815_v28 }
  0x66   :  { %1322 = vmatpush3.bf16.msra.mxu0 %v1321_v15  ;;  %1122 = vmatprep.mubr.msk.f32.mxu0 %vm1358_vm0, %v1359_v10 }
  0x67   :  { %1319 = vmatpush3.bf16.msra.mxu1 %v1318_v16 }
  0x69   :  { %1123 = vmatmul.mubr.msk.f32.vlgmr.msra.gmra.mrb[6].mxu0 %vm262_vm1, %v578_v17 }
  0x6a   :  { %793 = vmatmul.mubr.f32.vlgmr.msra.gmra.mrb[6].mxu1 %v1868_v53 }
  0xf8   :  { %v927_v49 = vpop.f32.mrb[0].mxu0 }
  0xf9   :  { %v962_v18 = vpop.f32.mrb[0].mxu1  ;;  %v928_v19 = vpop.f32.mrb[1].mxu0 }
  0xfa   :  { %v929_v20 = vadd.f32 %v928_v19, %v927_v49  ;;  %v963_v21 = vpop.f32.mrb[1].mxu1 }
  0xfb   :  { %v964_v63 = vadd.f32 %v963_v21, %v962_v18 }
  0xfd   :  { %v402_v22 = vadd.f32 %v964_v63, %v929_v20  ;;  %v541_v23 = vpop.f32.mrb[2].mxu1 }
  0xfe   :  { %v1117_v28 = vpop.f32.mrb[3].mxu1 }
 0x118   :  { %v997_v24 = vpop.f32.mrb[2].mxu0 }
 0x119   :  { %v998_v13 = vpop.f32.mrb[3].mxu0 }
 0x11a   :  { %v999_v25 = vadd.f32 %v998_v13, %v997_v24 }
 0x11c   :  { %v472_v26 = vadd.f32 %v999_v25, %v402_v22 }
 0x11d   :  { %v1035_v27 = vpop.f32.mrb[4].mxu1 }
 0x11e   :  { %v542_v10 = vadd.f32 %v541_v23, %v472_v26  ;;  %v1036_v29 = vpop.f32.mrb[5].mxu1 }
 0x11f   :  { %v1037_v30 = vadd.f32 %v1036_v29, %v1035_v27 }
 0x121   :  { %v655_v31 = vadd.f32 %v1037_v30, %v542_v10 }
 0x138   :  { %v1070_v32 = vpop.f32.mrb[4].mxu0 }
 0x139   :  { %v1071_v53 = vpop.f32.mrb[5].mxu0 }
 0x13a   :  { %v1072_v33 = vadd.f32 %v1071_v53, %v1070_v32 }
 0x13c   :  { %v725_v34 = vadd.f32 %v1072_v33, %v655_v31  ;;  %v864_v35 = vpop.f32.mrb[6].mxu0 }
 0x13d   :  { %v1105_v36 = vpop.f32.mrb[6].mxu1  ;;  %v1124_v37 = vpop.f32.mrb[7].mxu0 }
 0x13e   :  { %v1106_v38 = vpop.f32.mrb[7].mxu1 }
 0x13f   :  { %v1107_v39 = vadd.f32 %v1106_v38, %v1105_v36 }
 0x141   :  { %v795_v40 = vadd.f32 %v1107_v39, %v725_v34 }
 0x143   :  { %v865_v42 = vadd.f32 %v864_v35, %v795_v40 }
 0x145   :  { %v875_v43 = vadd.f32 %v894_v41, %v865_v42 }
 0x147   :  { %877 = vst.msk [vmem:[#allocation2] sm:$0x3] %vm876_vm2, %v875_v43 }
 0x148   :  { %1343 = shalt.err (!%p1340_p4)
}
 0x149   :  { %s1344_s29 = scalar_lea.hbm %s2059_s5, 32 }
 0x14a   :  { %p1345_p5 = scmp.ne.s32.totalorder %s2059_s5, %s1344_s29  ;;  %p1348_p6 = scmp.lt.u32.totalorder %s1344_s29, %s2059_s5 }
 0x14c   :  { %p1350_p7 = pnand %p1348_p6, %p1345_p5 }
 0x14e   :  { %1353 = shalt.err (!%p1350_p7)
}
 0x14f   :  { %887 = dma.vmem_to_hbm [thread:$0]  %s885_s3, 32, %s2059_s5, [#allocation3]  }
 0x150   :  { %1354 = dma.done.wait [#allocation3], 32  }
 0x151   :  { %1355 = vsyncadd [#allocation3], 4294967264 }
 0x152   :  { %891 = vsyncpa [#allocation3], 1 }

</bundles_post_ra>
